<compile_context>
chip_gen: v7x
topology: tpu7x:2x2x1
jax: 0.10.0
libtpu: 0.0.40
codegen_flags: <defaults>
</compile_context>

<pallas_src>
import functools

import jax
import jax.numpy as jnp
from jax.experimental import pallas as pl
from jax.experimental.pallas import tpu as pltpu


_VMEM_LIMIT = 48 * 1024 * 1024   # safe on v5e/v6e (128 MiB) and v7x (64 MiB/TC)


def _mish_kernel(x_ref, o_ref):
    x = x_ref[...]
    xf = x.astype(jnp.float32)
    # tanh(softplus(x)) == t / (t + 2)  with  t = e * (e + 2),  e = exp(x).
    # Clamp the exponent at 20 (PyTorch's softplus threshold): for x > 20 the
    # ratio rounds to 1.0 in f32, so mish(x) == x, matching torch exactly.
    e = jnp.exp(jnp.minimum(xf, 20.0))
    t = e * (e + 2.0)
    if o_ref.dtype == jnp.float32:
        # Exact divide: approx reciprocal (~2^-12 rel err) would miss 1e-5.
        o_ref[...] = xf * (t / (t + 2.0))
    else:
        # Low-precision output: approx reciprocal runs on the EUP (free slot
        # next to exp) and the epilogue multiply stays in the output dtype;
        # error is well within bf16/f16 output eps.
        r = t * pl.reciprocal(t + 2.0, approx=True)
        o_ref[...] = (x * r.astype(x.dtype)).astype(o_ref.dtype)


def _mish_jnp(x):
    # Same formulation as the kernel, for the (tiny) ragged tail.
    xf = x.astype(jnp.float32)
    e = jnp.exp(jnp.minimum(xf, 20.0))
    t = e * (e + 2.0)
    return (xf * (t / (t + 2.0))).astype(x.dtype)


def _pick_block_rows(rows, lanes, itemsize, target_block_bytes):
    """Rows per block: ~target bytes, sublane-aligned, and >=4 (preferably
    even) grid steps for slabs above ~1 MiB so the DMA pipeline overlaps and
    both v7x TensorCores stay busy."""
    sub = max(8, 32 // itemsize)        # sublane packing: 8 f32 / 16 bf16 / 32 i8
    if rows <= sub:
        return rows                     # block == full array dims (legal)
    bytes_per_row = lanes * itemsize
    ideal = max(sub, (target_block_bytes // bytes_per_row) // sub * sub)
    nsteps = pl.cdiv(rows, ideal)
    if rows * bytes_per_row > (1 << 20):
        nsteps = max(nsteps, 4)         # never disable pipelining for >1 MiB slabs
    if nsteps > 1 and nsteps % 2:
        nsteps += 1                     # even grid length balances v7x's 2 TCs
    block_rows = pl.cdiv(rows, nsteps)
    block_rows = min(((block_rows + sub - 1) // sub) * sub, rows)
    return block_rows


def _mish_slab(x2d, target_block_bytes):
    rows, lanes = x2d.shape
    block_rows = _pick_block_rows(rows, lanes, x2d.dtype.itemsize,
                                  target_block_bytes)
    return pl.pallas_call(
        _mish_kernel,
        out_shape=jax.ShapeDtypeStruct((rows, lanes), x2d.dtype),
        grid_spec=pltpu.PrefetchScalarGridSpec(
            num_scalar_prefetch=0,
            grid=(pl.cdiv(rows, block_rows),),
            in_specs=[pl.BlockSpec((block_rows, lanes), lambda i: (i, 0))],
            out_specs=pl.BlockSpec((block_rows, lanes), lambda i: (i, 0)),
        ),
        compiler_params=pltpu.CompilerParams(
            dimension_semantics=("parallel",),
            vmem_limit_bytes=_VMEM_LIMIT,
        ),
    )(x2d)


@functools.partial(jax.jit, static_argnames=("target_block_bytes",))
def mish(x, *, target_block_bytes=8 * 1024 * 1024):
    """Mish(x) = x * tanh(softplus(x)), elementwise, any shape / float dtype."""
    orig_shape = x.shape
    n = x.size
    if n == 0:
        return x

    # Widest lane-dense slab (multiple of 128) that divides n exactly: the
    # common case needs no extra HBM passes at all.
    lanes = None
    for c in (8192, 4096, 2048, 1024, 512, 256, 128):
        if n % c == 0:
            lanes = c
            break

    x_flat = jnp.ravel(x)
    if lanes is not None:
        out = _mish_slab(x_flat.reshape(n // lanes, lanes), target_block_bytes)
        return out.reshape(orig_shape)

    # Ragged flat size: stream the 128-aligned prefix through the kernel and
    # finish the (<128-element) tail with plain jnp — no pad / slice passes.
    lanes = 128
    n_main = (n // lanes) * lanes
    if n_main == 0:
        return _mish_jnp(x)
    out_main = _mish_slab(x_flat[:n_main].reshape(n_main // lanes, lanes),
                          target_block_bytes)
    out_tail = _mish_jnp(x_flat[n_main:])
    return jnp.concatenate([out_main.reshape(-1), out_tail]).reshape(orig_shape)


def _mish_reference(x):
    xf = x.astype(jnp.float32)
    sp = jnp.where(xf > 20.0, xf, jnp.log1p(jnp.exp(jnp.minimum(xf, 20.0))))
    return (xf * jnp.tanh(sp)).astype(x.dtype)


if __name__ == "__main__":
    # Shape implied by the module's elementwise forward: small NCHW tensor.
    key = jax.random.PRNGKey(0)
    x = jax.random.normal(key, (2, 4, 16, 16), dtype=jnp.float32) * 3.0

    y = mish(x)
    jax.block_until_ready(y)
    assert y.shape == x.shape and y.dtype == x.dtype
    assert jnp.allclose(y, _mish_reference(x), atol=1e-5, rtol=1e-5)

    # Ragged flat size (1050 elements): exercises the prefix-kernel + jnp-tail path.
    x2 = jax.random.normal(jax.random.PRNGKey(1), (3, 50, 7), dtype=jnp.float32) * 3.0
    y2 = mish(x2)
    jax.block_until_ready(y2)
    assert jnp.allclose(y2, _mish_reference(x2), atol=1e-5, rtol=1e-5)

    # bf16 path (approx reciprocal + bf16 epilogue): loose tolerance = bf16 eps.
    x3 = (jax.random.normal(jax.random.PRNGKey(2), (4, 8, 128)) * 3.0).astype(jnp.bfloat16)
    y3 = mish(x3)
    jax.block_until_ready(y3)
    ref3 = _mish_reference(x3.astype(jnp.float32)).astype(jnp.bfloat16)
    assert jnp.allclose(y3.astype(jnp.float32), ref3.astype(jnp.float32),
                        atol=2e-2, rtol=2e-2)

    print("KERNEL_OK")
</pallas_src>

<mosaic_0001>
module attributes {stable_mosaic.version = 11 : i64} {
  func.func @_mish_kernel(%arg0: i32, %arg1: memref<1x2048xf32, #tpu.memory_space<vmem>>, %arg2: memref<1x2048xf32, #tpu.memory_space<vmem>>) attributes {dimension_semantics = [#tpu.dimension_semantics<parallel>], iteration_bounds = array<i64: 1>, scalar_prefetch = 0 : i64, scratch_operands = 0 : i64, tpu.core_type = #tpu.core_type<tc>, window_params = [{transform_indices = @transform_0, window_bounds = array<i64: 1, 2048>}, {transform_indices = @transform_1, window_bounds = array<i64: 1, 2048>}]} {
    %c0 = arith.constant 0 : index
    %c0_0 = arith.constant 0 : index
    %0 = vector.load %arg1[%c0, %c0_0] : memref<1x2048xf32, #tpu.memory_space<vmem>>, vector<1x2048xf32>
    %cst = arith.constant 2.000000e+01 : f32
    %1 = vector.broadcast %cst : f32 to vector<1x2048xf32>
    %2 = arith.minimumf %0, %1 : vector<1x2048xf32>
    %3 = math.exp %2 : vector<1x2048xf32>
    %cst_1 = arith.constant 2.000000e+00 : f32
    %4 = vector.broadcast %cst_1 : f32 to vector<1x2048xf32>
    %5 = arith.addf %3, %4 : vector<1x2048xf32>
    %6 = arith.mulf %3, %5 : vector<1x2048xf32>
    %cst_2 = arith.constant 2.000000e+00 : f32
    %7 = vector.broadcast %cst_2 : f32 to vector<1x2048xf32>
    %8 = arith.addf %6, %7 : vector<1x2048xf32>
    %9 = arith.divf %6, %8 : vector<1x2048xf32>
    %10 = arith.mulf %0, %9 : vector<1x2048xf32>
    %c0_3 = arith.constant 0 : index
    %c0_4 = arith.constant 0 : index
    %11 = vector.load %arg2[%c0_3, %c0_4] : memref<1x2048xf32, #tpu.memory_space<vmem>>, vector<1x2048xf32>
    tpu.vector_store %arg2[%c0_3, %c0_4], %10 {strides = array<i32>} : memref<1x2048xf32, #tpu.memory_space<vmem>>, vector<1x2048xf32>,
    return
  }
  func.func @transform_0(%arg0: i32) -> (i32, i32) {
    %c0_i32 = arith.constant 0 : i32
    %c0_i32_0 = arith.constant 0 : i32
    return %arg0, %c0_i32 : i32, i32
  }
  func.func @transform_1(%arg0: i32) -> (i32, i32) {
    %c0_i32 = arith.constant 0 : i32
    %c0_i32_0 = arith.constant 0 : i32
    return %arg0, %c0_i32 : i32, i32
  }
}

</mosaic_0001>

<bundles_post_ra>
// kernel: mish.1
= control target key start
LH: loop header
LB: loop body
LE: loop exit
PB: predicated region body
PF: predicated region fallthrough
CT: control target
= control target key end

     0   :  { %s64_s0 = inlined_call_operand.vmem [shape: f32[1,2048], index: 0, kind: input, shape index: {}]   ;;  %s65_s1 = inlined_call_operand.vmem [shape: f32[1,2048], index: 1, kind: output, shape index: {}]  }
   0x1   :  { %v8_v0 = vld [vmem:[%s64_s0] sm:$0xff]  ;;  %v9_v1 = vld [vmem:[%s64_s0 + $0x8] sm:$0xff] }
   0x2   :  { %v10_v2 = vmin.f32 %v8_v0, 20.0  ;;  %v11_v3 = vmin.f32 %v9_v1, 20.0 }
   0x4   :  { %v12_v4 = vmul.f32 1.442695, %v10_v2  ;;  %v14_v5 = vmul.f32 1.442695, %v11_v3 }
   0x6   :  { %34 = vpow2.f32 %v12_v4 }
   0x7   :  { %36 = vpow2.f32 %v14_v5 }
  0x10   :  { %v35_v6 = vpop.eup %34 }
  0x11   :  { %v37_v7 = vpop.eup %36  ;;  %v16_v8 = vadd.f32 2.0, %v35_v6 }
  0x12   :  { %v17_v9 = vadd.f32 2.0, %v37_v7 }
  0x13   :  { %v18_v10 = vmul.f32 %v35_v6, %v16_v8 }
  0x14   :  { %v19_v11 = vmul.f32 %v37_v7, %v17_v9 }
  0x15   :  { %v20_v12 = vadd.f32 2.0, %v18_v10 }
  0x16   :  { %v21_v13 = vadd.f32 2.0, %v19_v11 }
  0x17   :  { %38 = vrcp.f32 %v20_v12 }
  0x18   :  { %40 = vrcp.f32 %v21_v13 }
  0x21   :  { %v39_v14 = vpop.eup %38 }
  0x22   :  { %v41_v15 = vpop.eup %40  ;;  %v23_v16 = vmul.f32 %v39_v14, %v18_v10 }
  0x23   :  { %v25_v17 = vmul.f32 %v41_v15, %v19_v11 }
  0x24   :  { %v26_v18 = vmul.f32 %v23_v16, %v8_v0 }
  0x25   :  { %v27_v19 = vmul.f32 %v25_v17, %v9_v1 }
  0x26   :  { %28 = vst [vmem:[%s65_s1] sm:$0xff] %v26_v18 }
  0x27   :  { %29 = vst [vmem:[%s65_s1 + $0x8] sm:$0xff] %v27_v19 }

</bundles_post_ra>
